<compile_context>
chip_gen: v5e
topology: v5e:2x2
jax: 0.10.0
libtpu: 0.0.40
codegen_flags: <defaults>
</compile_context>

<pallas_src>
import functools

import jax
import jax.numpy as jnp
from jax.experimental import pallas as pl
from jax.experimental.pallas import tpu as pltpu


def _dwconv_kernel(x_ref, w_ref, b_ref, o_ref, *, H, W, C):
    """Process one block of whole images laid out as rows of (B*H, W*C).

    x_ref: (R, W*C)    input rows, R = b_blk * H (whole images only)
    w_ref: (3, 3, W*C) per-lane depthwise taps; kw=0/2 edge lanes pre-zeroed
    b_ref: (1, W*C)    per-lane bias
    o_ref: (R, W*C)
    """
    WC = W * C
    R = x_ref.shape[0]
    x = x_ref[...]                                     # native dtype (f32/bf16)

    # Row-validity masks for the vertical (kh) shifts.  Rows wrap across image
    # boundaries inside the block, but exactly those rows are the masked ones.
    ridx = jax.lax.broadcasted_iota(jnp.int32, (R, WC), 0)
    h = ridx % H
    ok_up = h > 0            # row above exists   (dh = -1 tap valid)
    ok_dn = h < (H - 1)      # row below exists   (dh = +1 tap valid)

    # Start the accumulator from the broadcast bias (saves a full add pass).
    acc = jnp.broadcast_to(b_ref[...].astype(jnp.float32), (R, WC))
    zero = jnp.zeros((), x.dtype)

    for kh, dh in ((0, -1), (1, 0), (2, 1)):
        if dh == 0:
            x_h = x
        else:
            # x_h[r, :] = x[r + dh, :]  (sublane roll; wrapped rows masked)
            x_h = pltpu.roll(x, shift=(-dh) % R, axis=0)
            x_h = jnp.where(ok_dn if dh == 1 else ok_up, x_h, zero)
        for kw, dw in ((0, -1), (1, 0), (2, 1)):
            if dw == 0:
                t = x_h
            else:
                # t[:, l] = x_h[:, l + dw*C]  (lane roll by one pixel = C lanes;
                # wrapped lanes are killed by the pre-masked weight vector)
                t = pltpu.roll(x_h, shift=(-dw * C) % WC, axis=1)
            wt = w_ref[kh, kw:kw + 1, :]               # (1, W*C), f32
            acc = acc + t.astype(jnp.float32) * wt
    o_ref[...] = acc.astype(o_ref.dtype)


def _pick_batch_block(B, H, WC, itemsize, target_bytes=2 * 1024 * 1024):
    """Largest divisor of B whose input block stays under ~target_bytes and
    whose row count (b_blk*H) respects the sublane (8) tiling constraint."""
    per_image = max(1, H * WC * itemsize)
    cap = max(1, target_bytes // per_image)
    best = 1
    for b_blk in range(1, B + 1):
        if B % b_blk == 0 and b_blk <= cap and ((b_blk * H) % 8 == 0 or b_blk == B):
            best = b_blk
    if (best * H) % 8 != 0 and best != B:
        best = B   # block shape equal to the full array dims is always legal
    return best


def dwconv_pallas(x, weight, bias, H, W):
    """Depthwise 3x3 conv, stride 1, padding 1, groups=C, with bias.

    x:      (B, N, C) with N == H * W      (token-major, as in the PyTorch module)
    weight: (3, 3, C)  where weight[kh, kw, c] == torch_weight[c, 0, kh, kw]
    bias:   (C,)
    returns (B, N, C)
    """
    B, N, C = x.shape
    assert N == H * W, (N, H, W)
    assert weight.shape == (3, 3, C), weight.shape
    assert bias.shape == (C,), bias.shape

    WC = W * C
    # (B, N, C) -> (B*H, W*C): pure metadata reshape (row r = b*H + h,
    # lane l = w*C + c); identical element order to the NHWC interpretation.
    x2d = x.reshape(B * H, WC)

    # Pre-tile weight/bias onto the lane layout and bake the horizontal-edge
    # (kw = +/-1) padding masks into the weight so the kernel needs no lane mask.
    w_flat = jnp.tile(weight.astype(jnp.float32), (1, 1, W))            # (3,3,W*C)
    wpos = jnp.arange(WC, dtype=jnp.int32) // C                         # pixel column per lane
    lane_mask = jnp.stack(
        [
            (wpos > 0).astype(jnp.float32),       # kw=0 (dw=-1): no left neighbour at w == 0
            jnp.ones((WC,), jnp.float32),         # kw=1 (dw= 0)
            (wpos < W - 1).astype(jnp.float32),   # kw=2 (dw=+1): no right neighbour at w == W-1
        ],
        axis=0,
    )                                                                   # (3, W*C)
    w_flat = w_flat * lane_mask[None, :, :]
    b_flat = jnp.tile(bias.astype(jnp.float32), (W,)).reshape(1, WC)    # (1, W*C)

    b_blk = _pick_batch_block(B, H, WC, x.dtype.itemsize)
    rows_per_block = b_blk * H
    grid = (B // b_blk,)

    kernel = functools.partial(_dwconv_kernel, H=H, W=W, C=C)

    out2d = pl.pallas_call(
        kernel,
        out_shape=jax.ShapeDtypeStruct((B * H, WC), x.dtype),
        grid_spec=pltpu.PrefetchScalarGridSpec(
            num_scalar_prefetch=0,
            grid=grid,
            in_specs=[
                pl.BlockSpec((rows_per_block, WC), lambda i: (i, 0)),
                pl.BlockSpec((3, 3, WC), lambda i: (0, 0, 0)),
                pl.BlockSpec((1, WC), lambda i: (0, 0)),
            ],
            out_specs=pl.BlockSpec((rows_per_block, WC), lambda i: (i, 0)),
        ),
        compiler_params=pltpu.CompilerParams(
            dimension_semantics=("parallel",),
            vmem_limit_bytes=32 * 1024 * 1024,
        ),
    )(x2d, w_flat, b_flat)

    return out2d.reshape(B, N, C)


def _reference_dwconv(x, weight, bias, H, W):
    """Pure-JAX reference (depthwise conv via lax.conv_general_dilated)."""
    B, N, C = x.shape
    x_nhwc = x.reshape(B, H, W, C)
    w = weight.reshape(3, 3, 1, C)          # HWIO with feature_group_count=C
    out = jax.lax.conv_general_dilated(
        x_nhwc, w, window_strides=(1, 1), padding="SAME",
        dimension_numbers=("NHWC", "HWIO", "NHWC"),
        feature_group_count=C)
    out = out + bias.reshape(1, 1, 1, C)
    return out.reshape(B, N, C)


if __name__ == "__main__":
    # Small deterministic example: dim (C) = 32, H = W = 16, B = 2, N = 256.
    B, H, W, C = 2, 16, 16, 32
    N = H * W

    key = jax.random.PRNGKey(0)
    kx, kw, kb = jax.random.split(key, 3)
    x = jax.random.normal(kx, (B, N, C), dtype=jnp.float32)
    # PyTorch depthwise Conv2d weight is (C, 1, 3, 3); stored here as (3, 3, C).
    weight = jax.random.normal(kw, (3, 3, C), dtype=jnp.float32) * 0.1
    bias = jax.random.normal(kb, (C,), dtype=jnp.float32) * 0.1

    out = dwconv_pallas(x, weight, bias, H, W)
    out = jax.block_until_ready(out)

    ref = _reference_dwconv(x, weight, bias, H, W)
    assert out.shape == (B, N, C)
    assert jnp.allclose(out, ref, atol=1e-4, rtol=1e-4), "mismatch vs reference"

    print("KERNEL_OK")
</pallas_src>

<mosaic_0001>
module attributes {stable_mosaic.version = 11 : i64} {
  func.func @_dwconv_kernel(%arg0: i32, %arg1: memref<32x512xf32, #tpu.memory_space<vmem>>, %arg2: memref<3x3x512xf32, #tpu.memory_space<vmem>>, %arg3: memref<1x512xf32, #tpu.memory_space<vmem>>, %arg4: memref<32x512xf32, #tpu.memory_space<vmem>>) attributes {dimension_semantics = [#tpu.dimension_semantics<parallel>], iteration_bounds = array<i64: 1>, scalar_prefetch = 0 : i64, scratch_operands = 0 : i64, tpu.core_type = #tpu.core_type<tc>, window_params = [{transform_indices = @transform_0, window_bounds = array<i64: 32, 512>}, {pipeline_mode = #tpu.pipeline_mode<synchronous>, transform_indices = @transform_1, window_bounds = array<i64: 3, 3, 512>}, {pipeline_mode = #tpu.pipeline_mode<synchronous>, transform_indices = @transform_2, window_bounds = array<i64: 1, 512>}, {transform_indices = @transform_3, window_bounds = array<i64: 32, 512>}]} {
    %c0 = arith.constant 0 : index
    %c0_0 = arith.constant 0 : index
    %0 = vector.load %arg1[%c0, %c0_0] : memref<32x512xf32, #tpu.memory_space<vmem>>, vector<32x512xf32>
    %1 = tpu.iota {dimensions = array<i32: 0>} : vector<32x512xi32>
    %c16_i32 = arith.constant 16 : i32
    %c0_i32 = arith.constant 0 : i32
    %2 = arith.cmpi eq, %c16_i32, %c0_i32 : i32
    %c1_i32 = arith.constant 1 : i32
    %3 = arith.select %2, %c1_i32, %c16_i32 : i32
    %4 = vector.broadcast %3 : i32 to vector<32x512xi32>
    %5 = arith.remsi %1, %4 : vector<32x512xi32>
    %c0_i32_1 = arith.constant 0 : i32
    %6 = vector.broadcast %c0_i32_1 : i32 to vector<32x512xi32>
    %7 = arith.cmpi ne, %5, %6 : vector<32x512xi32>
    %c0_i32_2 = arith.constant 0 : i32
    %8 = vector.broadcast %c0_i32_2 : i32 to vector<32x512xi32>
    %9 = arith.cmpi slt, %5, %8 : vector<32x512xi32>
    %c0_i32_3 = arith.constant 0 : i32
    %10 = arith.cmpi slt, %3, %c0_i32_3 : i32
    %11 = vector.broadcast %10 : i1 to vector<32x512xi1>
    %12 = vector.broadcast %11 : vector<32x512xi1> to vector<32x512xi1>
    %13 = arith.xori %9, %12 : vector<32x512xi1>
    %14 = arith.andi %13, %7 : vector<32x512xi1>
    %15 = vector.broadcast %3 : i32 to vector<32x512xi32>
    %16 = arith.addi %5, %15 : vector<32x512xi32>
    %17 = arith.select %14, %16, %5 : vector<32x512xi1>, vector<32x512xi32>
    %c0_i32_4 = arith.constant 0 : i32
    %18 = vector.broadcast %c0_i32_4 : i32 to vector<32x512xi32>
    %19 = arith.cmpi sgt, %17, %18 : vector<32x512xi32>
    %c15_i32 = arith.constant 15 : i32
    %20 = vector.broadcast %c15_i32 : i32 to vector<32x512xi32>
    %21 = arith.cmpi slt, %17, %20 : vector<32x512xi32>
    %c0_5 = arith.constant 0 : index
    %c0_6 = arith.constant 0 : index
    %22 = vector.load %arg3[%c0_5, %c0_6] : memref<1x512xf32, #tpu.memory_space<vmem>>, vector<1x512xf32>
    %23 = vector.shape_cast %22 : vector<1x512xf32> to vector<1x512xf32>
    %24 = vector.broadcast %23 : vector<1x512xf32> to vector<32x512xf32>
    %c1_i32_7 = arith.constant 1 : i32
    %25 = tpu.dynamic_rotate %0 by %c1_i32_7 dim 0 : vector<32x512xf32>, i32 -> vector<32x512xf32>
    %cst = arith.constant 0.000000e+00 : f32
    %26 = vector.broadcast %cst : f32 to vector<32x512xf32>
    %27 = arith.select %19, %25, %26 : vector<32x512xi1>, vector<32x512xf32>
    %c32_i32 = arith.constant 32 : i32
    %28 = tpu.dynamic_rotate %27 by %c32_i32 dim 1 : vector<32x512xf32>, i32 -> vector<32x512xf32>
    %c0_8 = arith.constant 0 : index
    %c0_9 = arith.constant 0 : index
    %c0_10 = arith.constant 0 : index
    %29 = vector.load %arg2[%c0_8, %c0_9, %c0_10] : memref<3x3x512xf32, #tpu.memory_space<vmem>>, vector<1x1x512xf32>
    %30 = vector.shape_cast %29 : vector<1x1x512xf32> to vector<1x512xf32>
    %31 = vector.broadcast %30 : vector<1x512xf32> to vector<32x512xf32>
    %32 = arith.mulf %28, %31 : vector<32x512xf32>
    %33 = arith.addf %24, %32 : vector<32x512xf32>
    %c0_11 = arith.constant 0 : index
    %c1 = arith.constant 1 : index
    %c0_12 = arith.constant 0 : index
    %34 = vector.load %arg2[%c0_11, %c1, %c0_12] : memref<3x3x512xf32, #tpu.memory_space<vmem>>, vector<1x1x512xf32>
    %35 = vector.shape_cast %34 : vector<1x1x512xf32> to vector<1x512xf32>
    %36 = vector.broadcast %35 : vector<1x512xf32> to vector<32x512xf32>
    %37 = arith.mulf %27, %36 : vector<32x512xf32>
    %38 = arith.addf %33, %37 : vector<32x512xf32>
    %c480_i32 = arith.constant 480 : i32
    %39 = tpu.dynamic_rotate %27 by %c480_i32 dim 1 : vector<32x512xf32>, i32 -> vector<32x512xf32>
    %c0_13 = arith.constant 0 : index
    %c2 = arith.constant 2 : index
    %c0_14 = arith.constant 0 : index
    %40 = vector.load %arg2[%c0_13, %c2, %c0_14] : memref<3x3x512xf32, #tpu.memory_space<vmem>>, vector<1x1x512xf32>
    %41 = vector.shape_cast %40 : vector<1x1x512xf32> to vector<1x512xf32>
    %42 = vector.broadcast %41 : vector<1x512xf32> to vector<32x512xf32>
    %43 = arith.mulf %39, %42 : vector<32x512xf32>
    %44 = arith.addf %38, %43 : vector<32x512xf32>
    %c32_i32_15 = arith.constant 32 : i32
    %45 = tpu.dynamic_rotate %0 by %c32_i32_15 dim 1 : vector<32x512xf32>, i32 -> vector<32x512xf32>
    %c1_16 = arith.constant 1 : index
    %c0_17 = arith.constant 0 : index
    %c0_18 = arith.constant 0 : index
    %46 = vector.load %arg2[%c1_16, %c0_17, %c0_18] : memref<3x3x512xf32, #tpu.memory_space<vmem>>, vector<1x1x512xf32>
    %47 = vector.shape_cast %46 : vector<1x1x512xf32> to vector<1x512xf32>
    %48 = vector.broadcast %47 : vector<1x512xf32> to vector<32x512xf32>
    %49 = arith.mulf %45, %48 : vector<32x512xf32>
    %50 = arith.addf %44, %49 : vector<32x512xf32>
    %c1_19 = arith.constant 1 : index
    %c1_20 = arith.constant 1 : index
    %c0_21 = arith.constant 0 : index
    %51 = vector.load %arg2[%c1_19, %c1_20, %c0_21] : memref<3x3x512xf32, #tpu.memory_space<vmem>>, vector<1x1x512xf32>
    %52 = vector.shape_cast %51 : vector<1x1x512xf32> to vector<1x512xf32>
    %53 = vector.broadcast %52 : vector<1x512xf32> to vector<32x512xf32>
    %54 = arith.mulf %0, %53 : vector<32x512xf32>
    %55 = arith.addf %50, %54 : vector<32x512xf32>
    %c480_i32_22 = arith.constant 480 : i32
    %56 = tpu.dynamic_rotate %0 by %c480_i32_22 dim 1 : vector<32x512xf32>, i32 -> vector<32x512xf32>
    %c1_23 = arith.constant 1 : index
    %c2_24 = arith.constant 2 : index
    %c0_25 = arith.constant 0 : index
    %57 = vector.load %arg2[%c1_23, %c2_24, %c0_25] : memref<3x3x512xf32, #tpu.memory_space<vmem>>, vector<1x1x512xf32>
    %58 = vector.shape_cast %57 : vector<1x1x512xf32> to vector<1x512xf32>
    %59 = vector.broadcast %58 : vector<1x512xf32> to vector<32x512xf32>
    %60 = arith.mulf %56, %59 : vector<32x512xf32>
    %61 = arith.addf %55, %60 : vector<32x512xf32>
    %c31_i32 = arith.constant 31 : i32
    %62 = tpu.dynamic_rotate %0 by %c31_i32 dim 0 : vector<32x512xf32>, i32 -> vector<32x512xf32>
    %cst_26 = arith.constant 0.000000e+00 : f32
    %63 = vector.broadcast %cst_26 : f32 to vector<32x512xf32>
    %64 = arith.select %21, %62, %63 : vector<32x512xi1>, vector<32x512xf32>
    %c32_i32_27 = arith.constant 32 : i32
    %65 = tpu.dynamic_rotate %64 by %c32_i32_27 dim 1 : vector<32x512xf32>, i32 -> vector<32x512xf32>
    %c2_28 = arith.constant 2 : index
    %c0_29 = arith.constant 0 : index
    %c0_30 = arith.constant 0 : index
    %66 = vector.load %arg2[%c2_28, %c0_29, %c0_30] : memref<3x3x512xf32, #tpu.memory_space<vmem>>, vector<1x1x512xf32>
    %67 = vector.shape_cast %66 : vector<1x1x512xf32> to vector<1x512xf32>
    %68 = vector.broadcast %67 : vector<1x512xf32> to vector<32x512xf32>
    %69 = arith.mulf %65, %68 : vector<32x512xf32>
    %70 = arith.addf %61, %69 : vector<32x512xf32>
    %c2_31 = arith.constant 2 : index
    %c1_32 = arith.constant 1 : index
    %c0_33 = arith.constant 0 : index
    %71 = vector.load %arg2[%c2_31, %c1_32, %c0_33] : memref<3x3x512xf32, #tpu.memory_space<vmem>>, vector<1x1x512xf32>
    %72 = vector.shape_cast %71 : vector<1x1x512xf32> to vector<1x512xf32>
    %73 = vector.broadcast %72 : vector<1x512xf32> to vector<32x512xf32>
    %74 = arith.mulf %64, %73 : vector<32x512xf32>
    %75 = arith.addf %70, %74 : vector<32x512xf32>
    %c480_i32_34 = arith.constant 480 : i32
    %76 = tpu.dynamic_rotate %64 by %c480_i32_34 dim 1 : vector<32x512xf32>, i32 -> vector<32x512xf32>
    %c2_35 = arith.constant 2 : index
    %c2_36 = arith.constant 2 : index
    %c0_37 = arith.constant 0 : index
    %77 = vector.load %arg2[%c2_35, %c2_36, %c0_37] : memref<3x3x512xf32, #tpu.memory_space<vmem>>, vector<1x1x512xf32>
    %78 = vector.shape_cast %77 : vector<1x1x512xf32> to vector<1x512xf32>
    %79 = vector.broadcast %78 : vector<1x512xf32> to vector<32x512xf32>
    %80 = arith.mulf %76, %79 : vector<32x512xf32>
    %81 = arith.addf %75, %80 : vector<32x512xf32>
    %c0_38 = arith.constant 0 : index
    %c0_39 = arith.constant 0 : index
    %82 = vector.load %arg4[%c0_38, %c0_39] : memref<32x512xf32, #tpu.memory_space<vmem>>, vector<32x512xf32>
    tpu.vector_store %arg4[%c0_38, %c0_39], %81 {strides = array<i32>} : memref<32x512xf32, #tpu.memory_space<vmem>>, vector<32x512xf32>,
    return
  }
  func.func @transform_0(%arg0: i32) -> (i32, i32) {
    %c0_i32 = arith.constant 0 : i32
    %c0_i32_0 = arith.constant 0 : i32
    return %arg0, %c0_i32 : i32, i32
  }
  func.func @transform_1(%arg0: i32) -> (i32, i32, i32) {
    %c0_i32 = arith.constant 0 : i32
    %c0_i32_0 = arith.constant 0 : i32
    %c0_i32_1 = arith.constant 0 : i32
    %c0_i32_2 = arith.constant 0 : i32
    return %c0_i32, %c0_i32_0, %c0_i32_1 : i32, i32, i32
  }
  func.func @transform_2(%arg0: i32) -> (i32, i32) {
    %c0_i32 = arith.constant 0 : i32
    %c0_i32_0 = arith.constant 0 : i32
    %c0_i32_1 = arith.constant 0 : i32
    return %c0_i32, %c0_i32_0 : i32, i32
  }
  func.func @transform_3(%arg0: i32) -> (i32, i32) {
    %c0_i32 = arith.constant 0 : i32
    %c0_i32_0 = arith.constant 0 : i32
    return %arg0, %c0_i32 : i32, i32
  }
}

</mosaic_0001>

<bundles_post_ra>
// kernel: tpu_custom_call.1
= control target key start
LH: loop header
LB: loop body
LE: loop exit
PB: predicated region body
PF: predicated region fallthrough
CT: control target
= control target key end

     0   :  { %8 = vsyncpa [#allocation3], 0  ;;  %s2296_s0 = inlined_call_operand.hbm [shape: f32[32,512], index: 0, kind: input, shape index: {}]   ;;  %s2297_s1 = inlined_call_operand.hbm [shape: f32[3,3,512], index: 1, kind: input, shape index: {}]   ;;  %s2298_s2 = inlined_call_operand.hbm [shape: f32[1,512], index: 2, kind: input, shape index: {}]   ;;  %s2299_s3 = inlined_call_operand.hbm [shape: f32[32,512], index: 3, kind: output, shape index: {}]  }
   0x1   :  { %9 = vsyncpa [#allocation6], 0  ;;  %s28_s14 = sshll.u32 %s2297_s1, 4  ;;  %s29_s14 = int_to_ptr.hbm [resolvable:$true] %s28_s14 }
   0x2   :  { %10 = vsyncpa [#allocation4], 0  ;;  %s1075_s15 = smov [#allocation5]   ;;  %s15_s19 = sshll.u32 %s2296_s0, 4  ;;  %s16_s19 = int_to_ptr.hbm [resolvable:$true] %s15_s19 }
   0x3   :  { %s30_s16 = sshll.u32 %s1075_s15, 4  ;;  %s1076_s20 = smov 256   ;;  %s31_s16 = int_to_ptr.vmem [resolvable:$true] %s30_s16 }
   0x4   :  { %s1077_s21 = smov 16   ;;  %s1078_s22 = smov [#allocation2]  }
   0x5   :  { %36 = dma.hbm_to_vmem [thread:$0]  %s29_s14, 768, %s31_s16, [#allocation6], %s1076_s20, %s1076_s20, %s1077_s21  }
   0x6   :  { %s17_s23 = sshll.u32 %s1078_s22, 4  ;;  %s1079_s24 = smov 512   ;;  %s18_s23 = int_to_ptr.vmem [resolvable:$true] %s17_s23 }
   0x7   :  { %s1080_s25 = smov 32   ;;  %s42_s27 = sshll.u32 %s2298_s2, 4  ;;  %s43_s27 = int_to_ptr.hbm [resolvable:$true] %s42_s27 }
   0x8   :  { %23 = dma.hbm_to_vmem [thread:$0]  %s16_s19, 2048, %s18_s23, [#allocation3], %s1079_s24, %s1079_s24, %s1080_s25  }
   0x9   :  { %s1081_s28 = smov [#allocation7]  }
   0xa   :  { %s44_s0 = sshll.u32 %s1081_s28, 4  ;;  %s45_s0 = int_to_ptr.vmem [resolvable:$true] %s44_s0 }
   0xb   :  { %47 = dma.hbm_to_vmem [thread:$0]  %s43_s27, 64, %s45_s0, [#allocation6]  }
   0xc   :  { %1069 = dma.done.wait [#allocation3], 2048  }
   0xd   :  { %1070 = vsyncadd [#allocation3], 4294965248 }
   0xe   :  { %1071 = dma.done.wait [#allocation6], 832  }
   0xf   :  { %1072 = vsyncadd [#allocation6], 4294966464  ;;  %v76_v0 = vlaneseq  ;;  %v1120_v3 = vld [vmem:[#allocation2 + $0x40] sm:$0xff]  ;;  %v1127_v7 = vld [vmem:[#allocation2 + $0x8] sm:$0xff]  ;;  %s1082_s2 = smov 96   ;;  %s1083_s29 = smov [#allocation8]  }
  0x10   :  { %2319 = vst [vmem:[#allocation12_spill] sm:$0xff] %v1120_v3  ;;  %v1122_v4 = vld [vmem:[#allocation2 + $0x60] sm:$0xff]  ;;  %v155_v5 = vrot.slane %v1120_v3, 7  ;;  %v1129_v8 = vld [vmem:[#allocation2 + $0x28] sm:$0xff]  ;;  %v148_v10 = vrot.slane %v1127_v7, 7  ;;  %v1175_v27 = vld [vmem:[#allocation2 + $0x10] sm:$0xff] }
  0x11   :  { %v1117_v1 = vshrl.u32 %v76_v0, 7  ;;  %2320 = vst [vmem:[#allocation13_spill] sm:$0xff] %v1122_v4  ;;  %v159_v6 = vrot.slane %v1122_v4, 7  ;;  %v152_v11 = vrot.slane %v1129_v8, 7  ;;  %v1134_v12 = vld [vmem:[#allocation2] sm:$0xff]  ;;  %v1138_v15 = vld [vmem:[#allocation2 + $0x68] sm:$0xff] }
  0x12   :  { %2321 = vst [vmem:[#allocation14_spill] sm:$0xff] %v1127_v7  ;;  %v1136_v13 = vld [vmem:[#allocation2 + $0x20] sm:$0xff]  ;;  %v147_v17 = vrot.slane %v1134_v12, 7  ;;  %v160_v19 = vrot.slane %v1138_v15, 7  ;;  %v1177_v28 = vld [vmem:[#allocation2 + $0x70] sm:$0xff]  ;;  %v1183_v30 = vld [vmem:[#allocation2 + $0x48] sm:$0xff] }
  0x13   :  { %v79_v2 = vadd.s32 16, %v1117_v1  ;;  %vm163_vm0 = vcmp.lt.s32.totalorder %v1117_v1, 1  ;;  %2322 = vst [vmem:[#allocation15_spill] sm:$0xff] %v1129_v8  ;;  %v85_v9 = vand.u32 15, %v1117_v1  ;;  %v151_v18 = vrot.slane %v1136_v13, 7  ;;  %v1204_v37 = vld [vmem:[#allocation2 + $0x30] sm:$0xff] }
  0x14   :  { %2323 = vst [vmem:[#allocation16_spill] sm:$0xff] %v1134_v12  ;;  %v1142_v16 = vsel %vm163_vm0, %v155_v5, %v159_v6  ;;  %v1151_v20 = vsel %vm163_vm0, %v148_v10, %v152_v11  ;;  %v177_v25 = vsel %vm163_vm0, %v160_v19, %v148_v10  ;;  %v176_v26 = vsel %vm163_vm0, %v159_v6, %v147_v17  ;;  %v1206_v38 = vld [vmem:[#allocation2 + $0x50] sm:$0xff]  ;;  %v1232_v46 = vld [vmem:[#allocation2 + $0x38] sm:$0xff]  ;;  %v1341_v6 = vld [vmem:[#allocation5 + $0x1] ss:$4 sm:$0xf] }
  0x15   :  { %2324 = vst [vmem:[#allocation17_spill] sm:$0xff] %v1136_v13  ;;  %v99_v14 = vand.u32 15, %v79_v2  ;;  %202 = vrot.lane.b32.xlu1 %v1142_v16, %s1080_s25  ;;  %206 = vrot.lane.b32.xlu2 %v1151_v20, %s1080_s25  ;;  %v1157_v21 = vsel %vm163_vm0, %v147_v17, %v151_v18  ;;  %v168_v23 = vsel %vm163_vm0, %v151_v18, %v155_v5  ;;  %vm1167_vm2 = vcmp.gt.s32.totalorder %v85_v9, 0  ;;  %v1234_v47 = vld [vmem:[#allocation2 + $0x58] sm:$0xff]  ;;  %s943_s30 = sshll.u32 %s1083_s29, 4  ;;  %s945_s6 = sshll.u32 %s2299_s3, 4  ;;  %s944_s30 = int_to_ptr.vmem [resolvable:$true] %s943_s30  ;;  %s946_s6 = int_to_ptr.hbm [resolvable:$true] %s945_s6 }
  0x16   :  { %198 = vrot.lane.b32.xlu0 %v1157_v21, %s1080_s25  ;;  %2329 = vst [vmem:[#allocation18_spill] sm:$0xff] %v1175_v27  ;;  %v1187_v31 = vsel %vm1167_vm2, %v177_v25, 0.0  ;;  %v1191_v32 = vsel %vm1167_vm2, %v176_v26, 0.0  ;;  %v149_v33 = vrot.slane %v1175_v27, 7  ;;  %v161_v34 = vrot.slane %v1177_v28, 7  ;;  %v1240_v49 = vld [vmem:[#allocation2 + $0x18] sm:$0xff] }
  0x17   :  { %vm1161_vm1 = vcmp.gt.s32.totalorder %v99_v14, 0  ;;  %v156_v35 = vrot.slane %v1183_v30, 7  ;;  %2330 = vst [vmem:[#allocation19_spill] sm:$0xff] %v1204_v37  ;;  %v153_v42 = vrot.slane %v1204_v37, 7  ;;  %v157_v43 = vrot.slane %v1206_v38, 7  ;;  %v1242_v50 = vld [vmem:[#allocation2 + $0x78] sm:$0xff] }
  0x18   :  { %v1181_v29 = vsel %vm1161_vm1, %v168_v23, 0.0  ;;  %v178_v36 = vsel %vm163_vm0, %v161_v34, %v149_v33  ;;  %2331 = vst [vmem:[#allocation20_spill] sm:$0xff] %v1232_v46  ;;  %v154_v53 = vrot.slane %v1232_v46, 7  ;;  %v158_v54 = vrot.slane %v1234_v47, 7 }
  0x19   :  { %v169_v39 = vsel %vm163_vm0, %v152_v11, %v156_v35  ;;  %v1212_v40 = vsel %vm163_vm0, %v156_v35, %v160_v19  ;;  %v1216_v41 = vsel %vm1167_vm2, %v178_v36, 0.0  ;;  %v170_v45 = vsel %vm163_vm0, %v153_v42, %v157_v43  ;;  %v1345_v9 = vld [vmem:[#allocation5] ss:$4 sm:$0xf] }
  0x1a   :  { %v1222_v44 = vsel %vm1161_vm1, %v169_v39, 0.0  ;;  %v1238_v48 = vsel %vm1161_vm1, %v170_v45, 0.0  ;;  %v1246_v51 = vsel %vm163_vm0, %v157_v43, %v161_v34  ;;  %v1250_v52 = vsel %vm163_vm0, %v149_v33, %v153_v42 }
  0x1b   :  { %v150_v55 = vrot.slane %v1240_v49, 7  ;;  %v162_v56 = vrot.slane %v1242_v50, 7  ;;  %v171_v57 = vsel %vm163_vm0, %v154_v53, %v158_v54  ;;  %v1339_v5 = vand.u32 127, %v76_v0  ;;  %v1357_v0 = vld [vmem:[#allocation7] sm:$0xf] }
  0x1c   :  { %v1272_v60 = vsel %vm1161_vm1, %v171_v57, 0.0  ;;  %v1348_v10 = vperm.slane %v1341_v6, 2  ;;  %v1353_v11 = vperm.slane %v1345_v9, 2  ;;  %v1361_v14 = vperm.slane %v1357_v0, 2 }
  0x1d   :  { %200 = vrot.lane.b32.xlu1 %v1181_v29, %s1080_s25  ;;  %204 = vrot.lane.b32.xlu2 %v1187_v31, %s1080_s25  ;;  %v179_v58 = vsel %vm163_vm0, %v162_v56, %v150_v55  ;;  %v1268_v59 = vsel %vm163_vm0, %v150_v55, %v154_v53  ;;  %2332 = vst [vmem:[#allocation21_spill] sm:$0xff] %v1272_v60  ;;  %vm230_vm3 = vcmp.lt.s32.totalorder %v1339_v5, 32  ;;  %v293_v25 = vperm.slane %v1341_v6, 1 }
  0x1e   :  { %196 = vrot.lane.b32.xlu0 %v1191_v32, %s1080_s25  ;;  %v1276_v61 = vsel %vm1167_vm2, %v179_v58, 0.0  ;;  %v1286_v62 = vsel %vm163_vm0, %v158_v54, %v162_v56  ;;  %v302_v19 = vmul.f32 %v1348_v10, %v1216_v41  ;;  %v250_v33 = vperm.slane %v1345_v9, 1 }
  0x1f   :  { %2333 = vst [vmem:[#allocation22_spill] sm:$0xff] %v1286_v62  ;;  %v140_v35 = vperm.slane %v1357_v0, 1  ;;  %v1397_v45 = vperm.slane %v1341_v6, 0  ;;  %v1402_v53 = vperm.slane %v1345_v9, 0  ;;  %vm364_vm4 = vcmp.lt.s32.totalorder %v1339_v5, 96 }
  0x20   :  { %vm665_vm5 = vcmp.lt.s32.totalorder %v1117_v1, 7 }
  0x25   :  { %210 = vrot.lane.b32.xlu1 %v1212_v40, %s1080_s25  ;;  %212 = vrot.lane.b32.xlu2 %v1216_v41, %s1080_s25 }
  0x26   :  { %208 = vrot.lane.b32.xlu0 %v1222_v44, %s1080_s25 }
  0x2d   :  { %216 = vrot.lane.b32.xlu1 %v1238_v48, %s1080_s25  ;;  %218 = vrot.lane.b32.xlu2 %v1246_v51, %s1080_s25 }
  0x2e   :  { %214 = vrot.lane.b32.xlu0 %v1250_v52, %s1080_s25 }
  0x35   :  { %222 = vrot.lane.b32.xlu1 %v1268_v59, %s1080_s25  ;;  %224 = vrot.lane.b32.xlu2 %v1272_v60, %s1080_s25 }
  0x36   :  { %220 = vrot.lane.b32.xlu0 %v1276_v61, %s1080_s25 }
  0x3d   :  { %332 = vrot.lane.b32.xlu1 %v1191_v32, %s1082_s2  ;;  %334 = vrot.lane.b32.xlu2 %v1157_v21, %s1082_s2 }
  0x3e   :  { %226 = vrot.lane.b32.xlu0 %v1286_v62, %s1080_s25 }
  0x45   :  { %338 = vrot.lane.b32.xlu1 %v1142_v16, %s1082_s2  ;;  %340 = vrot.lane.b32.xlu2 %v1187_v31, %s1082_s2 }
  0x46   :  { %336 = vrot.lane.b32.xlu0 %v1181_v29, %s1082_s2 }
  0x4d   :  { %344 = vrot.lane.b32.xlu1 %v1222_v44, %s1082_s2  ;;  %346 = vrot.lane.b32.xlu2 %v1212_v40, %s1082_s2 }
  0x4e   :  { %342 = vrot.lane.b32.xlu0 %v1151_v20, %s1082_s2 }
  0x55   :  { %350 = vrot.lane.b32.xlu1 %v1250_v52, %s1082_s2  ;;  %352 = vrot.lane.b32.xlu2 %v1238_v48, %s1082_s2 }
  0x56   :  { %348 = vrot.lane.b32.xlu0 %v1216_v41, %s1082_s2  ;;  %v305_v41 = vmul.f32 %v293_v25, %v1151_v20  ;;  %v1409_v20 = vperm.slane %v1357_v0, 0 }
  0x5d   :  { %356 = vrot.lane.b32.xlu1 %v1276_v61, %s1082_s2  ;;  %358 = vrot.lane.b32.xlu2 %v1268_v59, %s1082_s2 }
  0x5e   :  { %354 = vrot.lane.b32.xlu0 %v1246_v51, %s1082_s2 }
  0x65   :  { %362 = vrot.lane.b32.xlu1 %v1286_v62, %s1082_s2  ;;  %424 = vrot.lane.b32.xlu2 %v1134_v12, %s1080_s25 }
  0x66   :  { %360 = vrot.lane.b32.xlu0 %v1272_v60, %s1082_s2 }
  0x6d   :  { %428 = vrot.lane.b32.xlu1 %v1120_v3, %s1080_s25  ;;  %430 = vrot.lane.b32.xlu2 %v1122_v4, %s1080_s25 }
  0x6e   :  { %426 = vrot.lane.b32.xlu0 %v1136_v13, %s1080_s25 }
  0x6f   :  { %v1330_v63 = vpop.permute.xlu2 %206 }
  0x75   :  { %434 = vrot.lane.b32.xlu1 %v1129_v8, %s1080_s25  ;;  %436 = vrot.lane.b32.xlu2 %v1183_v30, %s1080_s25 }
  0x76   :  { %432 = vrot.lane.b32.xlu0 %v1127_v7, %s1080_s25 }
  0x77   :  { %v205_v2 = vpop.permute.xlu2 %204 }
  0x7d   :  { %440 = vrot.lane.b32.xlu1 %v1175_v27, %s1080_s25  ;;  %442 = vrot.lane.b32.xlu2 %v1204_v37, %s1080_s25 }
  0x7e   :  { %438 = vrot.lane.b32.xlu0 %v1138_v15, %s1080_s25 }
  0x7f   :  { %v1363_v17 = vpop.permute.xlu2 %212 }
  0x80   :  { %v235_v18 = vsel %vm230_vm3, %v205_v2, %v1363_v17 }
  0x81   :  { %v259_v22 = vmul.f32 %v1353_v11, %v235_v18  ;;  %v308_v18 = vmul.f32 %v1397_v45, %v1181_v29 }
  0x83   :  { %v275_v23 = vadd.f32 %v259_v22, %v1361_v14 }
  0x85   :  { %446 = vrot.lane.b32.xlu1 %v1177_v28, %s1080_s25  ;;  %448 = vrot.lane.b32.xlu2 %v1240_v49, %s1080_s25  ;;  %v1376_v24 = vadd.f32 %v302_v19, %v275_v23  ;;  %v301_v23 = vmul.f32 %v293_v25, %v1187_v31 }
  0x86   :  { %444 = vrot.lane.b32.xlu0 %v1206_v38, %s1080_s25 }
  0x87   :  { %2334 = vst [vmem:[#allocation23_spill] sm:$0xff] %v1376_v24  ;;  %v1381_v26 = vpop.permute.xlu1 %202  ;;  %v1384_v34 = vpop.permute.xlu2 %218 }
  0x88   :  { %v1387_v36 = vpop.permute.xlu0 %198 }
  0x89   :  { %v240_v39 = vsel %vm230_vm3, %v1387_v36, %v1330_v63 }
  0x8a   :  { %v262_v42 = vmul.f32 %v250_v33, %v240_v39 }
  0x8c   :  { %v278_v43 = vadd.f32 %v262_v42, %v140_v35 }
  0x8d   :  { %452 = vrot.lane.b32.xlu1 %v1234_v47, %s1080_s25  ;;  %454 = vrot.lane.b32.xlu2 %v1242_v50, %s1080_s25 }
  0x8e   :  { %450 = vrot.lane.b32.xlu0 %v1232_v46, %s1080_s25  ;;  %v1406_v55 = vadd.f32 %v305_v41, %v278_v43 }
  0x8f   :  { %v201_v54 = vpop.permute.xlu1 %200  ;;  %v225_v56 = vpop.permute.xlu2 %224 }
  0x90   :  { %v245_v57 = vsel %vm230_vm3, %v225_v56, %v201_v54  ;;  %v1413_v58 = vpop.permute.xlu0 %196 }
  0x91   :  { %v265_v19 = vmul.f32 %v1402_v53, %v245_v57  ;;  %v239_v22 = vsel %vm230_vm3, %v1413_v58, %v205_v2 }
  0x92   :  { %v258_v39 = vmul.f32 %v250_v33, %v239_v22 }
  0x93   :  { %v281_v41 = vadd.f32 %v265_v19, %v1409_v20 }
  0x94   :  { %v274_v42 = vadd.f32 %v258_v39, %v140_v35 }
  0x95   :  { %560 = vrot.lane.b32.xlu1 %v1136_v13, %s1082_s2  ;;  %562 = vrot.lane.b32.xlu2 %v1120_v3, %s1082_s2  ;;  %v1427_v43 = vadd.f32 %v308_v18, %v281_v41  ;;  %v313_v18 = vmul.f32 %v293_v25, %v1212_v40 }
  0x96   :  { %558 = vrot.lane.b32.xlu0 %v1134_v12, %s1082_s2  ;;  %v1431_v57 = vadd.f32 %v301_v23, %v274_v42  ;;  %v309_v23 = vmul.f32 %v293_v25, %v1222_v44 }
  0x97   :  { %v211_v29 = vpop.permute.xlu1 %210  ;;  %v1441_v19 = vpop.permute.xlu2 %334 }
  0x98   :  { %v1436_v31 = vsel %vm230_vm3, %v211_v29, %v1384_v34  ;;  %v242_v2 = vsel %vm230_vm3, %v1381_v26, %v211_v29  ;;  %v209_v39 = vpop.permute.xlu0 %208 }
  0x99   :  { %v270_v22 = vmul.f32 %v250_v33, %v242_v2  ;;  %v241_v41 = vsel %vm230_vm3, %v201_v54, %v209_v39 }
  0x9a   :  { %v266_v62 = vmul.f32 %v250_v33, %v241_v41  ;;  %v310_v33 = vmul.f32 %v1348_v10, %v1238_v48  ;;  %v304_v41 = vmul.f32 %v1397_v45, %v1157_v21 }
  0x9b   :  { %v286_v42 = vadd.f32 %v270_v22, %v140_v35 }
  0x9c   :  { %v282_v24 = vadd.f32 %v266_v62, %v140_v35 }
  0x9d   :  { %566 = vrot.lane.b32.xlu1 %v1127_v7, %s1082_s2  ;;  %v1449_v60 = vadd.f32 %v313_v18, %v286_v42  ;;  %568 = vrot.lane.b32.xlu2 %v1129_v8, %s1082_s2  ;;  %v306_v18 = vmul.f32 %v1348_v10, %v1250_v52 }
  0x9e   :  { %564 = vrot.lane.b32.xlu0 %v1122_v4, %s1082_s2  ;;  %v1455_v29 = vadd.f32 %v309_v23, %v282_v24 }
  0x9f   :  { %v217_v40 = vpop.permute.xlu1 %216  ;;  %v1463_v25 = vpop.permute.xlu2 %340 }
  0xa0   :  { %v1459_v44 = vsel %vm230_vm3, %v217_v40, %v225_v56  ;;  %v237_v62 = vsel %vm230_vm3, %v209_v39, %v217_v40  ;;  %v215_v54 = vpop.permute.xlu0 %214  ;;  %v1483_v39 = vperm.slane %v1341_v6, 3 }
  0xa1   :  { %v267_v35 = vmul.f32 %v1353_v11, %v237_v62  ;;  %v236_v24 = vsel %vm230_vm3, %v1330_v63, %v215_v54  ;;  %v1486_v63 = vperm.slane %v1345_v9, 3  ;;  %v1504_v62 = vperm.slane %v1357_v0, 3 }
  0xa2   :  { %v263_v56 = vmul.f32 %v1353_v11, %v236_v24  ;;  %v307_v9 = vmul.f32 %v1483_v39, %v1268_v59 }
  0xa3   :  { %v283_v2 = vadd.f32 %v267_v35, %v1361_v14 }
  0xa4   :  { %v279_v22 = vadd.f32 %v263_v56, %v1361_v14 }
  0xa5   :  { %572 = vrot.lane.b32.xlu1 %v1138_v15, %s1082_s2  ;;  %v1478_v48 = vadd.f32 %v310_v33, %v283_v2  ;;  %574 = vrot.lane.b32.xlu2 %v1175_v27, %s1082_s2 }
  0xa6   :  { %570 = vrot.lane.b32.xlu0 %v1183_v30, %s1082_s2  ;;  %v1499_v6 = vadd.f32 %v306_v18, %v279_v22 }
  0xa7   :  { %v223_v52 = vpop.permute.xlu1 %222  ;;  %v1497_v40 = vpop.permute.xlu2 %346 }
  0xa8   :  { %v232_v23 = vsel %vm230_vm3, %v215_v54, %v223_v52  ;;  %v244_v42 = vsel %vm230_vm3, %v223_v52, %v1387_v36  ;;  %v221_v35 = vpop.permute.xlu0 %220  ;;  %v1508_v54 = vld [vmem:[#allocation5 + $0x2] ss:$4 sm:$0xf]  ;;  %v300_v36 = vmul.f32 %v1397_v45, %v1191_v32  ;;  %v303_v32 = vmul.f32 %v1483_v39, %v1276_v61 }
  0xa9   :  { %v261_v33 = vmul.f32 %v1402_v53, %v244_v42  ;;  %v264_v21 = vmul.f32 %v1486_v63, %v232_v23  ;;  %v231_v24 = vsel %vm230_vm3, %v1363_v17, %v221_v35  ;;  %v243_v59 = vsel %vm230_vm3, %v221_v35, %v1413_v58 }
  0xaa   :  { %v257_v56 = vmul.f32 %v1402_v53, %v243_v59  ;;  %v260_v18 = vmul.f32 %v1486_v63, %v231_v24  ;;  %v1526_v22 = vperm.slane %v1508_v54, 0 }
  0xab   :  { %v277_v0 = vadd.f32 %v261_v33, %v1409_v20  ;;  %v280_v2 = vadd.f32 %v264_v21, %v1504_v62 }
  0xac   :  { %v273_v17 = vadd.f32 %v257_v56, %v1409_v20  ;;  %v276_v58 = vadd.f32 %v260_v18, %v1504_v62  ;;  %v653_v18 = vrot.slane %v1136_v13, 1 }
  0xad   :  { %578 = vrot.lane.b32.xlu1 %v1206_v38, %s1082_s2  ;;  %v323_v52 = vadd.f32 %v307_v9, %v280_v2  ;;  %v1532_v23 = vadd.f32 %v304_v41, %v277_v0  ;;  %580 = vrot.lane.b32.xlu2 %v1177_v28, %s1082_s2  ;;  %v78_v9 = vadd.s32 8, %v1117_v1  ;;  %v312_v0 = vmul.f32 %v1397_v45, %v1142_v16 }
  0xae   :  { %576 = vrot.lane.b32.xlu0 %v1204_v37, %s1082_s2  ;;  %v316_v42 = vadd.f32 %v300_v36, %v273_v17  ;;  %v1547_v41 = vadd.f32 %v303_v32, %v276_v58  ;;  %v657_v17 = vrot.slane %v1120_v3, 1  ;;  %v1572_v16 = vperm.slane %v1508_v54, 3 }
  0xaf   :  { %v1538_v61 = vpop.permute.xlu1 %332  ;;  %v1544_v21 = vpop.permute.xlu2 %352  ;;  %v92_v32 = vand.u32 15, %v78_v9 }
  0xb0   :  { %v373_v33 = vsel %vm364_vm4, %v1538_v61, %v1463_v25  ;;  %v227_v24 = vpop.permute.xlu0 %226  ;;  %v670_v9 = vsel %vm665_vm5, %v653_v18, %v657_v17 }
  0xb1   :  { %v392_v35 = vmul.f32 %v1526_v22, %v373_v33  ;;  %v1553_v59 = vsel %vm230_vm3, %v1384_v34, %v227_v24  ;;  %v246_v36 = vsel %vm230_vm3, %v227_v24, %v1381_v26  ;;  %v649_v26 = vrot.slane %v1134_v12, 1 }
  0xb2   :  { %v269_v56 = vmul.f32 %v1402_v53, %v246_v36  ;;  %v80_v53 = vadd.s32 24, %v1117_v1  ;;  %vm1584_vm6 = vcmp.lt.s32.totalorder %v92_v32, 15 }
  0xb3   :  { %v1560_v2 = vadd.f32 %v392_v35, %v316_v42 }
  0xb4   :  { %v285_v58 = vadd.f32 %v269_v56, %v1409_v20  ;;  %v1599_v56 = vsel %vm665_vm5, %v649_v26, %v653_v18  ;;  %v106_v3 = vand.u32 15, %v80_v53  ;;  %v650_v18 = vrot.slane %v1127_v7, 1 }
  0xb5   :  { %584 = vrot.lane.b32.xlu1 %v1232_v46, %s1082_s2  ;;  %586 = vrot.lane.b32.xlu2 %v1234_v47, %s1082_s2 }
  0xb6   :  { %582 = vrot.lane.b32.xlu0 %v1240_v49, %s1082_s2  ;;  %v328_v45 = vadd.f32 %v312_v0, %v285_v58  ;;  %v1605_v58 = vsel %vm1584_vm6, %v670_v9, 0.0  ;;  %vm1621_vm7 = vcmp.lt.s32.totalorder %v106_v3, 15 }
  0xb7   :  { %v1577_v34 = vpop.permute.xlu1 %338  ;;  %v359_v42 = vpop.permute.xlu2 %358  ;;  %2337 = vst [vmem:[#allocation24_spill] sm:$0xff] %v1605_v58 }
  0xb8   :  { %v376_v20 = vsel %vm364_vm4, %v1577_v34, %v1497_v40  ;;  %v378_v24 = vsel %vm364_vm4, %v359_v42, %v1441_v19  ;;  %v1594_v36 = vpop.permute.xlu0 %336 }
  0xb9   :  { %v404_v35 = vmul.f32 %v1526_v22, %v376_v20  ;;  %v399_v0 = vmul.f32 %v1572_v16, %v378_v24  ;;  %v661_v20 = vrot.slane %v1122_v4, 1  ;;  %v1613_v24 = vperm.slane %v1508_v54, 1 }
  0xbb   :  { %v1601_v32 = vadd.f32 %v404_v35, %v328_v45  ;;  %v1608_v12 = vadd.f32 %v399_v0, %v323_v52  ;;  %v654_v45 = vrot.slane %v1129_v8, 1  ;;  %v678_v9 = vsel %vm665_vm5, %v661_v20, %v649_v26 }
  0xbc   :  { %v1642_v26 = vsel %vm1621_vm7, %v678_v9, 0.0 }
  0xbd   :  { %2338 = vst [vmem:[#allocation25_spill] sm:$0xff] %v1608_v12  ;;  %698 = vrot.lane.b32.xlu1 %v1599_v56, %s1080_s25  ;;  %700 = vrot.lane.b32.xlu2 %v1605_v58, %s1080_s25  ;;  %v1646_v12 = vsel %vm665_vm5, %v650_v18, %v654_v45  ;;  %v662_v58 = vrot.slane %v1138_v15, 1 }
  0xbe   :  { %588 = vrot.lane.b32.xlu0 %v1242_v50, %s1082_s2 }
  0xbf   :  { %v345_v53 = vpop.permute.xlu1 %344  ;;  %v1633_v8 = vpop.permute.xlu2 %424 }
  0xc0   :  { %v371_v35 = vsel %vm364_vm4, %v345_v53, %v1544_v21  ;;  %v375_v0 = vsel %vm364_vm4, %v1594_v36, %v345_v53  ;;  %v343_v7 = vpop.permute.xlu0 %342 }
  0xc1   :  { %v400_v4 = vmul.f32 %v1526_v22, %v375_v0  ;;  %v401_v3 = vmul.f32 %v1613_v24, %v371_v35  ;;  %v374_v13 = vsel %vm364_vm4, %v1441_v19, %v343_v7  ;;  %v1658_v19 = vsel %vm665_vm5, %v657_v17, %v661_v20 }
  0xc2   :  { %v396_v35 = vmul.f32 %v1526_v22, %v374_v13 }
  0xc3   :  { %v1649_v53 = vadd.f32 %v400_v4, %v1427_v43  ;;  %v1652_v0 = vadd.f32 %v401_v3, %v1455_v29  ;;  %v1666_v4 = vperm.slane %v1508_v54, 2  ;;  %v658_v43 = vrot.slane %v1183_v30, 1 }
  0xc4   :  { %v1661_v9 = vadd.f32 %v396_v35, %v1532_v23  ;;  %v679_v29 = vsel %vm665_vm5, %v662_v58, %v650_v18 }
  0xc5   :  { %704 = vrot.lane.b32.xlu1 %v1642_v26, %s1080_s25  ;;  %706 = vrot.lane.b32.xlu2 %v1646_v12, %s1080_s25  ;;  %v671_v35 = vsel %vm665_vm5, %v654_v45, %v658_v43 }
  0xc6   :  { %702 = vrot.lane.b32.xlu0 %v1658_v19, %s1080_s25 }
  0xc7   :  { %v351_v13 = vpop.permute.xlu1 %350  ;;  %v1679_v54 = vpop.permute.xlu2 %430 }
  0xc8   :  { %v366_v22 = vsel %vm364_vm4, %v351_v13, %v359_v42  ;;  %v370_v23 = vsel %vm364_vm4, %v343_v7, %v351_v13  ;;  %v349_v3 = vpop.permute.xlu0 %348  ;;  %v1690_v42 = vsel %vm665_vm5, %v658_v43, %v662_v58  ;;  %v1694_v7 = vsel %vm1621_vm7, %v679_v29, 0.0 }
  0xc9   :  { %v397_v17 = vmul.f32 %v1613_v24, %v370_v23  ;;  %v398_v20 = vmul.f32 %v1666_v4, %v366_v22  ;;  %v369_v18 = vsel %vm364_vm4, %v1463_v25, %v349_v3  ;;  %2341 = vst [vmem:[#allocation26_spill] sm:$0xff] %v1690_v42  ;;  %v655_v13 = vrot.slane %v1204_v37, 1 }
  0xca   :  { %v393_v45 = vmul.f32 %v1613_v24, %v369_v18  ;;  %v659_v25 = vrot.slane %v1206_v38, 1  ;;  %v1707_v58 = vsel %vm1584_vm6, %v671_v35, 0.0  ;;  %v271_v43 = vmul.f32 %v1353_v11, %v1436_v31 }
  0xcb   :  { %v1698_v22 = vadd.f32 %v397_v17, %v1406_v55  ;;  %v1701_v23 = vadd.f32 %v398_v20, %v1499_v6  ;;  %v663_v55 = vrot.slane %v1177_v28, 1  ;;  %v314_v6 = vmul.f32 %v1348_v10, %v1246_v51 }
  0xcc   :  { %v1712_v29 = vadd.f32 %v393_v45, %v1431_v57  ;;  %v268_v17 = vmul.f32 %v1486_v63, %v1459_v44  ;;  %v672_v57 = vsel %vm665_vm5, %v655_v13, %v659_v25  ;;  %v272_v31 = vmul.f32 %v1486_v63, %v1553_v59  ;;  %v2342_v44 = vld [vmem:[#allocation21_spill] sm:$0xff] }
  0xcd   :  { %710 = vrot.lane.b32.xlu1 %v1690_v42, %s1080_s25  ;;  %712 = vrot.lane.b32.xlu2 %v1694_v7, %s1080_s25  ;;  %v651_v10 = vrot.slane %v1175_v27, 1  ;;  %v311_v35 = vmul.f32 %v1483_v39, %v2342_v44  ;;  %v287_v18 = vadd.f32 %v271_v43, %v1361_v14  ;;  %v656_v44 = vrot.slane %v1232_v46, 1  ;;  %v2345_v14 = vld [vmem:[#allocation23_spill] sm:$0xff]  ;;  %v2346_v27 = vld [vmem:[#allocation22_spill] sm:$0xff] }
  0xce   :  { %708 = vrot.lane.b32.xlu0 %v1707_v58, %s1080_s25  ;;  %v284_v37 = vadd.f32 %v268_v17, %v1504_v62 }
  0xcf   :  { %v357_v11 = vpop.permute.xlu1 %356  ;;  %v1734_v51 = vpop.permute.xlu2 %436  ;;  %v1768_v46 = vsel %vm665_vm5, %v651_v10, %v655_v13 }
  0xd0   :  { %v365_v20 = vsel %vm364_vm4, %v349_v3, %v357_v11  ;;  %v377_v28 = vsel %vm364_vm4, %v357_v11, %v1538_v61  ;;  %v355_v59 = vpop.permute.xlu0 %354  ;;  %v1747_v61 = vsel %vm1584_vm6, %v672_v57, 0.0  ;;  %v1751_v11 = vsel %vm665_vm5, %v659_v25, %v663_v55 }
  0xd1   :  { %v394_v45 = vmul.f32 %v1666_v4, %v365_v20  ;;  %v395_v63 = vmul.f32 %v1572_v16, %v377_v28  ;;  %v372_v3 = vsel %vm364_vm4, %v1497_v40, %v355_v59  ;;  %2343 = vst [vmem:[#allocation21_spill] sm:$0xff] %v1747_v61  ;;  %v660_v40 = vrot.slane %v1234_v47, 1 }
  0xd2   :  { %2344 = vst [vmem:[#allocation27_spill] sm:$0xff] %v1751_v11  ;;  %v405_v28 = vmul.f32 %v1613_v24, %v372_v3  ;;  %v315_v57 = vmul.f32 %v1483_v39, %v2346_v27  ;;  %v288_v25 = vadd.f32 %v272_v31, %v1504_v62  ;;  %v330_v27 = vadd.f32 %v314_v6, %v287_v18 }
  0xd3   :  { %v1755_v43 = vadd.f32 %v394_v45, %v2345_v14  ;;  %v1758_v20 = vadd.f32 %v395_v63, %v1547_v41  ;;  %v652_v41 = vrot.slane %v1240_v49, 1  ;;  %v673_v62 = vsel %vm665_vm5, %v656_v44, %v660_v40 }
  0xd4   :  { %v1771_v45 = vadd.f32 %v405_v28, %v1449_v60  ;;  %v331_v24 = vadd.f32 %v315_v57, %v288_v25  ;;  %v327_v31 = vadd.f32 %v311_v35, %v284_v37  ;;  %v680_v14 = vsel %vm665_vm5, %v663_v55, %v651_v10  ;;  %v473_v35 = vld [vmem:[#allocation5 + $0x10] ss:$4 sm:$0xf] }
  0xd5   :  { %716 = vrot.lane.b32.xlu1 %v1747_v61, %s1080_s25  ;;  %718 = vrot.lane.b32.xlu2 %v1751_v11, %s1080_s25  ;;  %v1793_v18 = vsel %vm665_vm5, %v652_v41, %v656_v44  ;;  %v664_v28 = vrot.slane %v1242_v50, 1  ;;  %v476_v25 = vperm.slane %v473_v35, 1 }
  0xd6   :  { %714 = vrot.lane.b32.xlu0 %v1768_v46, %s1080_s25 }
  0xd7   :  { %v363_v39 = vpop.permute.xlu1 %362  ;;  %v1787_v17 = vpop.permute.xlu2 %442 }
  0xd8   :  { %v368_v60 = vsel %vm364_vm4, %v355_v59, %v363_v39  ;;  %v380_v13 = vsel %vm364_vm4, %v363_v39, %v1577_v34  ;;  %v361_v6 = vpop.permute.xlu0 %360  ;;  %v1805_v34 = vsel %vm1584_vm6, %v673_v62, 0.0 }
  0xd9   :  { %v406_v63 = vmul.f32 %v1666_v4, %v368_v60  ;;  %v407_v3 = vmul.f32 %v1572_v16, %v380_v13  ;;  %v367_v59 = vsel %vm364_vm4, %v1544_v21, %v361_v6  ;;  %v379_v37 = vsel %vm364_vm4, %v361_v6, %v1594_v36  ;;  %2347 = vst [vmem:[#allocation23_spill] sm:$0xff] %v1805_v34 }
  0xda   :  { %v402_v55 = vmul.f32 %v1666_v4, %v367_v59  ;;  %v403_v10 = vmul.f32 %v1572_v16, %v379_v37  ;;  %v1816_v21 = vsel %vm1621_vm7, %v680_v14, 0.0  ;;  %v477_v6 = vperm.slane %v473_v35, 2 }
  0xdb   :  { %v1808_v44 = vadd.f32 %v406_v63, %v330_v27  ;;  %v1810_v57 = vadd.f32 %v407_v3, %v331_v24  ;;  %2348 = vst [vmem:[#allocation22_spill] sm:$0xff] %v1816_v21  ;;  %v1827_v27 = vperm.slane %v473_v35, 0  ;;  %v1857_v3 = vsel %vm665_vm5, %v660_v40, %v664_v28 }
  0xdc   :  { %v1819_v36 = vadd.f32 %v402_v55, %v1478_v48  ;;  %v1821_v33 = vadd.f32 %v403_v10, %v327_v31  ;;  %v681_v48 = vsel %vm665_vm5, %v664_v28, %v652_v41  ;;  %2349 = vst [vmem:[#allocation28_spill] sm:$0xff] %v1857_v3 }
  0xdd   :  { %722 = vrot.lane.b32.xlu1 %v1793_v18, %s1080_s25  ;;  %724 = vrot.lane.b32.xlu2 %v1805_v34, %s1080_s25  ;;  %v1847_v31 = vsel %vm1621_vm7, %v681_v48, 0.0 }
  0xde   :  { %720 = vrot.lane.b32.xlu0 %v1816_v21, %s1080_s25 }
  0xdf   :  { %v1831_v16 = vpop.permute.xlu1 %428  ;;  %v449_v39 = vpop.permute.xlu2 %448 }
  0xe0   :  { %v466_v4 = vsel %vm230_vm3, %v1831_v16, %v1734_v51  ;;  %v468_v24 = vsel %vm230_vm3, %v449_v39, %v1633_v8  ;;  %v1842_v60 = vpop.permute.xlu0 %426 }
  0xe1   :  { %v492_v62 = vmul.f32 %v476_v25, %v466_v4  ;;  %v483_v13 = vmul.f32 %v1827_v27, %v468_v24 }
  0xe3   :  { %v1850_v41 = vadd.f32 %v492_v62, %v1652_v0  ;;  %v1853_v63 = vadd.f32 %v483_v13, %v1560_v2  ;;  %v478_v13 = vperm.slane %v473_v35, 3 }
  0xe5   :  { %728 = vrot.lane.b32.xlu1 %v1847_v31, %s1080_s25  ;;  %832 = vrot.lane.b32.xlu2 %v1599_v56, %s1082_s2 }
  0xe6   :  { %726 = vrot.lane.b32.xlu0 %v1857_v3, %s1080_s25 }
  0xe7   :  { %v435_v52 = vpop.permute.xlu1 %434  ;;  %v455_v0 = vpop.permute.xlu2 %454 }
  0xe8   :  { %v461_v2 = vsel %vm230_vm3, %v435_v52, %v1787_v17  ;;  %v465_v1 = vsel %vm230_vm3, %v1842_v60, %v435_v52  ;;  %v471_v59 = vsel %vm230_vm3, %v455_v0, %v1679_v54  ;;  %v433_v37 = vpop.permute.xlu0 %432 }
  0xe9   :  { %v488_v40 = vmul.f32 %v476_v25, %v465_v1  ;;  %v489_v14 = vmul.f32 %v477_v6, %v461_v2  ;;  %v495_v28 = vmul.f32 %v1827_v27, %v471_v59  ;;  %v464_v55 = vsel %vm230_vm3, %v1633_v8, %v433_v37  ;;  %v2350_v8 = vld [vmem:[#allocation24_spill] sm:$0xff] }
  0xea   :  { %v484_v4 = vmul.f32 %v476_v25, %v464_v55 }
  0xeb   :  { %v1879_v10 = vadd.f32 %v488_v40, %v1698_v22  ;;  %v1882_v48 = vadd.f32 %v489_v14, %v1701_v23  ;;  %v1885_v62 = vadd.f32 %v495_v28, %v1601_v32 }
  0xec   :  { %v1888_v24 = vadd.f32 %v484_v4, %v1712_v29 }
  0xed   :  { %836 = vrot.lane.b32.xlu1 %v1658_v19, %s1082_s2  ;;  %838 = vrot.lane.b32.xlu2 %v1642_v26, %s1082_s2 }
  0xee   :  { %834 = vrot.lane.b32.xlu0 %v2350_v8, %s1082_s2 }
  0xef   :  { %v441_v22 = vpop.permute.xlu1 %440  ;;  %v1900_v52 = vpop.permute.xlu2 %562 }
  0xf0   :  { %v456_v23 = vsel %vm230_vm3, %v441_v22, %v449_v39  ;;  %v460_v32 = vsel %vm230_vm3, %v433_v37, %v441_v22  ;;  %v439_v1 = vpop.permute.xlu0 %438 }
  0xf1   :  { %v485_v29 = vmul.f32 %v477_v6, %v460_v32  ;;  %v486_v2 = vmul.f32 %v478_v13, %v456_v23  ;;  %v467_v35 = vsel %vm230_vm3, %v1679_v54, %v439_v1  ;;  %v1944_v32 = vld [vmem:[#allocation5 + $0x11] ss:$4 sm:$0xf] }
  0xf2   :  { %v496_v59 = vmul.f32 %v476_v25, %v467_v35 }
  0xf3   :  { %v1906_v40 = vadd.f32 %v485_v29, %v1755_v43  ;;  %v1909_v14 = vadd.f32 %v486_v2, %v1758_v20 }
  0xf4   :  { %v1912_v39 = vadd.f32 %v496_v59, %v1771_v45  ;;  %v518_v59 = vperm.slane %v1944_v32, 0 }
  0xf5   :  { %842 = vrot.lane.b32.xlu1 %v1707_v58, %s1082_s2  ;;  %844 = vrot.lane.b32.xlu2 %v1690_v42, %s1082_s2 }
  0xf6   :  { %840 = vrot.lane.b32.xlu0 %v1646_v12, %s1082_s2 }
  0xf7   :  { %v447_v54 = vpop.permute.xlu1 %446  ;;  %v1924_v25 = vpop.permute.xlu2 %568 }
  0xf8   :  { %v459_v43 = vsel %vm230_vm3, %v447_v54, %v455_v0  ;;  %v463_v20 = vsel %vm230_vm3, %v439_v1, %v447_v54  ;;  %v445_v28 = vpop.permute.xlu0 %444  ;;  %v1961_v54 = vld [vmem:[#allocation5 + $0x12] ss:$4 sm:$0xf] }
  0xf9   :  { %v497_v45 = vmul.f32 %v477_v6, %v463_v20  ;;  %v498_v37 = vmul.f32 %v478_v13, %v459_v43  ;;  %v462_v55 = vsel %vm230_vm3, %v1734_v51, %v445_v28 }
  0xfa   :  { %v493_v23 = vmul.f32 %v477_v6, %v462_v55 }
  0xfb   :  { %v1930_v4 = vadd.f32 %v497_v45, %v1808_v44  ;;  %v1933_v22 = vadd.f32 %v498_v37, %v1810_v57 }
  0xfc   :  { %v1936_v0 = vadd.f32 %v493_v23, %v1819_v36  ;;  %v609_v23 = vperm.slane %v1961_v54, 0 }
  0xfd   :  { %848 = vrot.lane.b32.xlu1 %v1768_v46, %s1082_s2  ;;  %850 = vrot.lane.b32.xlu2 %v1747_v61, %s1082_s2 }
  0xfe   :  { %846 = vrot.lane.b32.xlu0 %v1694_v7, %s1082_s2 }
  0xff   :  { %v453_v51 = vpop.permute.xlu1 %452  ;;  %v1951_v36 = vpop.permute.xlu2 %574 }
 0x100   :  { %v458_v44 = vsel %vm230_vm3, %v445_v28, %v453_v51  ;;  %v470_v57 = vsel %vm230_vm3, %v453_v51, %v1831_v16  ;;  %v451_v2 = vpop.permute.xlu0 %450  ;;  %v2351_v28 = vld [vmem:[#allocation25_spill] sm:$0xff] }
 0x101   :  { %v491_v6 = vmul.f32 %v1827_v27, %v470_v57  ;;  %v494_v29 = vmul.f32 %v478_v13, %v458_v44  ;;  %v457_v1 = vsel %vm230_vm3, %v1787_v17, %v451_v2  ;;  %v469_v35 = vsel %vm230_vm3, %v451_v2, %v1842_v60  ;;  %v2352_v17 = vld [vmem:[#allocation17_spill] sm:$0xff] }
 0x102   :  { %v487_v20 = vmul.f32 %v1827_v27, %v469_v35  ;;  %v490_v45 = vmul.f32 %v478_v13, %v457_v1  ;;  %v530_v60 = vmul.f32 %v518_v59, %v2352_v17  ;;  %v519_v57 = vperm.slane %v1944_v32, 1  ;;  %v2354_v1 = vld [vmem:[#allocation14_spill] sm:$0xff] }
 0x103   :  { %v507_v16 = vadd.f32 %v491_v6, %v1649_v53  ;;  %v510_v43 = vadd.f32 %v494_v29, %v1821_v33  ;;  %v2353_v6 = vld [vmem:[#allocation16_spill] sm:$0xff]  ;;  %v1993_v2 = vperm.slane %v1944_v32, 3 }
 0x104   :  { %v503_v37 = vadd.f32 %v487_v20, %v1661_v9  ;;  %v1968_v55 = vadd.f32 %v490_v45, %v2351_v28  ;;  %v526_v29 = vmul.f32 %v518_v59, %v2353_v6  ;;  %v527_v35 = vmul.f32 %v519_v57, %v2354_v1 }
 0x105   :  { %854 = vrot.lane.b32.xlu1 %v1816_v21, %s1082_s2  ;;  %856 = vrot.lane.b32.xlu2 %v1793_v18, %s1082_s2  ;;  %v610_v20 = vperm.slane %v1961_v54, 1  ;;  %v537_v45 = vmul.f32 %v1993_v2, %v1234_v47 }
 0x106   :  { %852 = vrot.lane.b32.xlu0 %v1751_v11, %s1082_s2  ;;  %v546_v27 = vadd.f32 %v530_v60, %v503_v37  ;;  %v2004_v37 = vperm.slane %v1961_v54, 3  ;;  %v542_v17 = vadd.f32 %v526_v29, %v1853_v63  ;;  %v543_v47 = vadd.f32 %v527_v35, %v1888_v24 }
 0x107   :  { %v1978_v53 = vpop.permute.xlu1 %560  ;;  %v1984_v33 = vpop.permute.xlu2 %580  ;;  %v553_v63 = vadd.f32 %v537_v45, %v510_v43  ;;  %v539_v24 = vmul.f32 %v519_v57, %v1138_v15 }
 0x108   :  { %v599_v9 = vsel %vm364_vm4, %v1978_v53, %v1924_v25  ;;  %v1986_v51 = vpop.permute.xlu0 %558 }
 0x109   :  { %v621_v13 = vmul.f32 %v609_v23, %v599_v9 }
 0x10b   :  { %v1988_v44 = vadd.f32 %v621_v13, %v546_v27 }
 0x10d   :  { %860 = vrot.lane.b32.xlu1 %v1857_v3, %s1082_s2  ;;  %862 = vrot.lane.b32.xlu2 %v1847_v31, %s1082_s2 }
 0x10e   :  { %858 = vrot.lane.b32.xlu0 %v1805_v34, %s1082_s2 }
 0x10f   :  { %v567_v28 = vpop.permute.xlu1 %566  ;;  %v587_v27 = vpop.permute.xlu2 %586 }
 0x110   :  { %v594_v60 = vsel %vm364_vm4, %v567_v28, %v1951_v36  ;;  %v598_v9 = vsel %vm364_vm4, %v1986_v51, %v567_v28  ;;  %v604_v1 = vsel %vm364_vm4, %v587_v27, %v1900_v52  ;;  %v2019_v34 = vpop.permute.xlu0 %564  ;;  %v2355_v28 = vld [vmem:[#allocation13_spill] sm:$0xff] }
 0x111   :  { %v617_v13 = vmul.f32 %v609_v23, %v598_v9  ;;  %v618_v6 = vmul.f32 %v610_v20, %v594_v60  ;;  %v628_v29 = vmul.f32 %v2004_v37, %v604_v1  ;;  %v538_v42 = vmul.f32 %v518_v59, %v2355_v28  ;;  %v2356_v60 = vld [vmem:[#allocation12_spill] sm:$0xff] }
 0x112   :  { %v534_v9 = vmul.f32 %v518_v59, %v2356_v60  ;;  %v520_v1 = vperm.slane %v1944_v32, 2 }
 0x113   :  { %v2022_v61 = vadd.f32 %v617_v13, %v542_v17  ;;  %v2024_v3 = vadd.f32 %v618_v6, %v543_v47  ;;  %v2026_v11 = vadd.f32 %v628_v29, %v553_v63  ;;  %v554_v17 = vadd.f32 %v538_v42, %v1885_v62 }
 0x114   :  { %v555_v47 = vadd.f32 %v539_v24, %v1912_v39  ;;  %v550_v28 = vadd.f32 %v534_v9, %v507_v16  ;;  %v535_v42 = vmul.f32 %v519_v57, %v1183_v30  ;;  %v536_v62 = vmul.f32 %v520_v1, %v1206_v38  ;;  %v2357_v24 = vld [vmem:[#allocation15_spill] sm:$0xff] }
 0x116   :  { %v551_v16 = vadd.f32 %v535_v42, %v1850_v41  ;;  %v529_v42 = vmul.f32 %v1993_v2, %v1240_v49 }
 0x117   :  { %v573_v35 = vpop.permute.xlu1 %572  ;;  %v2037_v45 = vpop.permute.xlu2 %700 }
 0x118   :  { %v597_v21 = vsel %vm364_vm4, %v573_v35, %v1984_v33  ;;  %v601_v43 = vsel %vm364_vm4, %v2019_v34, %v573_v35  ;;  %v571_v15 = vpop.permute.xlu0 %570 }
 0x119   :  { %v629_v13 = vmul.f32 %v609_v23, %v601_v43  ;;  %v630_v6 = vmul.f32 %v610_v20, %v597_v21  ;;  %v600_v59 = vsel %vm364_vm4, %v1900_v52, %v571_v15  ;;  %v611_v21 = vperm.slane %v1961_v54, 2 }
 0x11a   :  { %v625_v35 = vmul.f32 %v609_v23, %v600_v59  ;;  %v531_v43 = vmul.f32 %v519_v57, %v2357_v24  ;;  %v552_v23 = vadd.f32 %v536_v62, %v1936_v0  ;;  %v2359_v59 = vld [vmem:[#allocation20_spill] sm:$0xff] }
 0x11b   :  { %v2045_v63 = vadd.f32 %v629_v13, %v554_v17  ;;  %v2047_v29 = vadd.f32 %v630_v6, %v555_v47  ;;  %v533_v0 = vmul.f32 %v1993_v2, %v2359_v59 }
 0x11c   :  { %v2049_v60 = vadd.f32 %v625_v35, %v550_v28  ;;  %v2360_v28 = vld [vmem:[#allocation18_spill] sm:$0xff] }
 0x11d   :  { %v528_v35 = vmul.f32 %v520_v1, %v2360_v28  ;;  %v549_v24 = vadd.f32 %v533_v0, %v1968_v55 }
 0x11f   :  { %v579_v39 = vpop.permute.xlu1 %578  ;;  %v2059_v17 = vpop.permute.xlu2 %706  ;;  %v544_v49 = vadd.f32 %v528_v35, %v1906_v40 }
 0x120   :  { %v592_v52 = vsel %vm364_vm4, %v579_v39, %v587_v27  ;;  %v596_v32 = vsel %vm364_vm4, %v571_v15, %v579_v39  ;;  %v577_v38 = vpop.permute.xlu0 %576  ;;  %v547_v27 = vadd.f32 %v531_v43, %v1879_v10  ;;  %v2358_v15 = vld [vmem:[#allocation19_spill] sm:$0xff] }
 0x121   :  { %v626_v30 = vmul.f32 %v610_v20, %v596_v32  ;;  %v627_v9 = vmul.f32 %v611_v21, %v592_v52  ;;  %v595_v54 = vsel %vm364_vm4, %v1924_v25, %v577_v38  ;;  %v532_v41 = vmul.f32 %v520_v1, %v2358_v15 }
 0x122   :  { %v622_v13 = vmul.f32 %v610_v20, %v595_v54 }
 0x123   :  { %v2066_v57 = vadd.f32 %v626_v30, %v551_v16  ;;  %v2068_v47 = vadd.f32 %v627_v9, %v552_v23  ;;  %v548_v39 = vadd.f32 %v532_v41, %v1882_v48  ;;  %v545_v16 = vadd.f32 %v529_v42, %v1909_v14  ;;  %v747_v30 = vld [vmem:[#allocation5 + $0x20] ss:$4 sm:$0xf] }
 0x124   :  { %v2071_v6 = vadd.f32 %v622_v13, %v547_v27  ;;  %v750_v40 = vperm.slane %v747_v30, 1  ;;  %v972_v13 = vld [vmem:[#allocation2 + $0x70] sm:$0xff] }
 0x125   :  { %v540_v14 = vmul.f32 %v972_v13, %v520_v1 }
 0x127   :  { %v585_v25 = vpop.permute.xlu1 %584  ;;  %v2084_v20 = vpop.permute.xlu2 %712  ;;  %v556_v28 = vadd.f32 %v540_v14, %v1930_v4 }
 0x128   :  { %v591_v62 = vsel %vm364_vm4, %v577_v38, %v585_v25  ;;  %v603_v10 = vsel %vm364_vm4, %v585_v25, %v1978_v53  ;;  %v583_v32 = vpop.permute.xlu0 %582 }
 0x129   :  { %v623_v43 = vmul.f32 %v611_v21, %v591_v62  ;;  %v624_v52 = vmul.f32 %v2004_v37, %v603_v10  ;;  %v590_v23 = vsel %vm364_vm4, %v1951_v36, %v583_v32  ;;  %v602_v53 = vsel %vm364_vm4, %v583_v32, %v1986_v51 }
 0x12a   :  { %v619_v55 = vmul.f32 %v611_v21, %v590_v23  ;;  %v620_v38 = vmul.f32 %v2004_v37, %v602_v53  ;;  %v541_v36 = vmul.f32 %v1993_v2, %v1242_v50 }
 0x12b   :  { %v639_v48 = vadd.f32 %v623_v43, %v548_v39  ;;  %v640_v9 = vadd.f32 %v624_v52, %v549_v24  ;;  %v749_v39 = vperm.slane %v747_v30, 0 }
 0x12c   :  { %v635_v54 = vadd.f32 %v619_v55, %v544_v49  ;;  %v2098_v27 = vadd.f32 %v620_v38, %v545_v16  ;;  %v557_v2 = vadd.f32 %v541_v36, %v1933_v22 }
 0x12f   :  { %v699_v15 = vpop.permute.xlu1 %698  ;;  %v2105_v41 = vpop.permute.xlu2 %718 }
 0x130   :  { %v738_v51 = vsel %vm230_vm3, %v699_v15, %v2059_v17  ;;  %v589_v0 = vpop.permute.xlu0 %588 }
 0x131   :  { %v758_v59 = vmul.f32 %v750_v40, %v738_v51  ;;  %v593_v35 = vsel %vm364_vm4, %v1984_v33, %v589_v0  ;;  %v605_v1 = vsel %vm364_vm4, %v589_v0, %v2019_v34  ;;  %v752_v51 = vperm.slane %v747_v30, 3 }
 0x132   :  { %v631_v42 = vmul.f32 %v611_v21, %v593_v35  ;;  %v632_v25 = vmul.f32 %v2004_v37, %v605_v1  ;;  %v751_v21 = vperm.slane %v747_v30, 2 }
 0x133   :  { %v2115_v50 = vadd.f32 %v758_v59, %v2024_v3 }
 0x134   :  { %v647_v62 = vadd.f32 %v631_v42, %v556_v28  ;;  %v648_v10 = vadd.f32 %v632_v25, %v557_v2 }
 0x137   :  { %v705_v4 = vpop.permute.xlu1 %704  ;;  %v725_v24 = vpop.permute.xlu2 %724 }
 0x138   :  { %v741_v33 = vsel %vm230_vm3, %v705_v4, %v2084_v20  ;;  %v743_v34 = vsel %vm230_vm3, %v725_v24, %v2037_v45  ;;  %v703_v3 = vpop.permute.xlu0 %702 }
 0x139   :  { %v770_v43 = vmul.f32 %v750_v40, %v741_v33  ;;  %v761_v52 = vmul.f32 %v749_v39, %v743_v34 }
 0x13b   :  { %v2126_v22 = vadd.f32 %v770_v43, %v2047_v29  ;;  %v2129_v37 = vadd.f32 %v761_v52, %v1988_v44 }
 0x13f   :  { %v711_v32 = vpop.permute.xlu1 %710  ;;  %v2136_v23 = vpop.permute.xlu2 %832 }
 0x140   :  { %v736_v49 = vsel %vm230_vm3, %v711_v32, %v2105_v41  ;;  %v740_v16 = vsel %vm230_vm3, %v703_v3, %v711_v32  ;;  %v709_v38 = vpop.permute.xlu0 %708 }
 0x141   :  { %v766_v53 = vmul.f32 %v750_v40, %v740_v16  ;;  %v767_v55 = vmul.f32 %v751_v21, %v736_v49  ;;  %v739_v29 = vsel %vm230_vm3, %v2037_v45, %v709_v38 }
 0x142   :  { %v762_v14 = vmul.f32 %v750_v40, %v739_v29 }
 0x143   :  { %v2142_v44 = vadd.f32 %v766_v53, %v2066_v57  ;;  %v2145_v13 = vadd.f32 %v767_v55, %v2068_v47  ;;  %v790_v55 = vld [vmem:[#allocation5 + $0x21] ss:$4 sm:$0xf] }
 0x144   :  { %v2148_v36 = vadd.f32 %v762_v14, %v2071_v6  ;;  %v792_v14 = vperm.slane %v790_v55, 0 }
 0x147   :  { %v717_v59 = vpop.permute.xlu1 %716  ;;  %v2154_v35 = vpop.permute.xlu2 %838 }
 0x148   :  { %v731_v0 = vsel %vm230_vm3, %v717_v59, %v725_v24  ;;  %v735_v28 = vsel %vm230_vm3, %v709_v38, %v717_v59  ;;  %v715_v1 = vpop.permute.xlu0 %714 }
 0x149   :  { %v763_v45 = vmul.f32 %v751_v21, %v735_v28  ;;  %v764_v57 = vmul.f32 %v752_v51, %v731_v0  ;;  %v734_v47 = vsel %vm230_vm3, %v2059_v17, %v715_v1  ;;  %v2192_v28 = vperm.slane %v790_v55, 3 }
 0x14a   :  { %v759_v30 = vmul.f32 %v751_v21, %v734_v47 }
 0x14b   :  { %v2159_v40 = vadd.f32 %v763_v45, %v639_v48  ;;  %v2161_v6 = vadd.f32 %v764_v57, %v640_v9  ;;  %v808_v45 = vmul.f32 %v792_v14, %v1658_v19 }
 0x14c   :  { %v2163_v2 = vadd.f32 %v759_v30, %v635_v54 }
 0x14f   :  { %v723_v42 = vpop.permute.xlu1 %722  ;;  %v2169_v24 = vpop.permute.xlu2 %844 }
 0x150   :  { %v730_v25 = vsel %vm230_vm3, %v715_v1, %v723_v42  ;;  %v742_v33 = vsel %vm230_vm3, %v723_v42, %v699_v15  ;;  %v721_v52 = vpop.permute.xlu0 %720  ;;  %v793_v42 = vperm.slane %v790_v55, 1 }
 0x151   :  { %v757_v43 = vmul.f32 %v749_v39, %v742_v33  ;;  %v760_v34 = vmul.f32 %v752_v51, %v730_v25  ;;  %v737_v17 = vsel %vm230_vm3, %v2084_v20, %v721_v52  ;;  %v804_v33 = vmul.f32 %v792_v14, %v2350_v8 }
 0x152   :  { %v771_v54 = vmul.f32 %v751_v21, %v737_v17  ;;  %v815_v17 = vmul.f32 %v2192_v28, %v1847_v31 }
 0x153   :  { %v773_v48 = vadd.f32 %v757_v43, %v2022_v61  ;;  %v776_v9 = vadd.f32 %v760_v34, %v2098_v27  ;;  %v805_v34 = vmul.f32 %v793_v42, %v1707_v58 }
 0x154   :  { %v2176_v32 = vadd.f32 %v771_v54, %v647_v62  ;;  %v881_v62 = vld [vmem:[#allocation5 + $0x22] ss:$4 sm:$0xf]  ;;  %v800_v54 = vmul.f32 %v792_v14, %v1599_v56 }
 0x155   :  { %v2201_v47 = vperm.slane %v881_v62, 3 }
 0x157   :  { %v729_v49 = vpop.permute.xlu1 %728  ;;  %v2182_v53 = vpop.permute.xlu2 %850 }
 0x158   :  { %v733_v15 = vsel %vm230_vm3, %v721_v52, %v729_v49  ;;  %v745_v16 = vsel %vm230_vm3, %v729_v49, %v705_v4  ;;  %v727_v20 = vpop.permute.xlu0 %726  ;;  %v2217_v52 = vperm.slane %v881_v62, 1 }
 0x159   :  { %v769_v38 = vmul.f32 %v749_v39, %v745_v16  ;;  %v772_v29 = vmul.f32 %v752_v51, %v733_v15  ;;  %v732_v61 = vsel %vm230_vm3, %v2105_v41, %v727_v20  ;;  %v744_v27 = vsel %vm230_vm3, %v727_v20, %v703_v3 }
 0x15a   :  { %v765_v4 = vmul.f32 %v749_v39, %v744_v27  ;;  %v768_v0 = vmul.f32 %v752_v51, %v732_v61  ;;  %v883_v41 = vperm.slane %v881_v62, 0  ;;  %v803_v3 = vmul.f32 %v2192_v28, %v1793_v18 }
 0x15b   :  { %v2190_v21 = vadd.f32 %v769_v38, %v2045_v63  ;;  %v788_v59 = vadd.f32 %v772_v29, %v648_v10  ;;  %v821_v16 = vadd.f32 %v805_v34, %v2148_v36 }
 0x15c   :  { %v781_v57 = vadd.f32 %v765_v4, %v2049_v60  ;;  %v2197_v1 = vadd.f32 %v768_v0, %v2026_v11  ;;  %v819_v30 = vadd.f32 %v803_v3, %v776_v9  ;;  %v820_v9 = vadd.f32 %v804_v33, %v2129_v37 }
 0x15d   :  { %v794_v37 = vperm.slane %v790_v55, 2  ;;  %v831_v20 = vadd.f32 %v815_v17, %v788_v59  ;;  %v801_v3 = vmul.f32 %v793_v42, %v1646_v12  ;;  %v812_v55 = vmul.f32 %v792_v14, %v1642_v26 }
 0x15e   :  { %v824_v19 = vadd.f32 %v808_v45, %v781_v57  ;;  %v816_v45 = vadd.f32 %v800_v54, %v773_v48  ;;  %v813_v33 = vmul.f32 %v793_v42, %v1694_v7 }
 0x15f   :  { %v2203_v63 = vpop.permute.xlu1 %836  ;;  %v857_v39 = vpop.permute.xlu2 %856 }
 0x160   :  { %v874_v10 = vsel %vm364_vm4, %v2203_v63, %v2169_v24  ;;  %v876_v11 = vsel %vm364_vm4, %v857_v39, %v2136_v23  ;;  %v2212_v60 = vpop.permute.xlu0 %834 }
 0x161   :  { %v899_v51 = vmul.f32 %v883_v41, %v874_v10  ;;  %v894_v18 = vmul.f32 %v2201_v47, %v876_v11  ;;  %v802_v10 = vmul.f32 %v794_v37, %v1768_v46  ;;  %v817_v11 = vadd.f32 %v801_v3, %v2115_v50 }
 0x163   :  { %v915_v25 = vadd.f32 %v899_v51, %v824_v19  ;;  %v910_v43 = vadd.f32 %v894_v18, %v819_v30  ;;  %v885_v51 = vperm.slane %v881_v62, 2  ;;  %v818_v12 = vadd.f32 %v802_v10, %v2163_v2  ;;  %v2362_v2 = vld [vmem:[#allocation26_spill] sm:$0xff] }
 0x164   :  { %v809_v17 = vmul.f32 %v793_v42, %v2362_v2 }
 0x165   :  { %931 = vst [vmem:[#allocation8 + $0x40] sm:$0xff] %v915_v25  ;;  %v828_v25 = vadd.f32 %v812_v55, %v2190_v21  ;;  %v829_v21 = vadd.f32 %v813_v33, %v2126_v22 }
 0x166   :  { %926 = vst [vmem:[#allocation8 + $0x18] sm:$0xff] %v910_v43  ;;  %v2361_v43 = vld [vmem:[#allocation22_spill] sm:$0xff] }
 0x167   :  { %v843_v49 = vpop.permute.xlu1 %842  ;;  %v863_v8 = vpop.permute.xlu2 %862  ;;  %v814_v34 = vmul.f32 %v794_v37, %v2361_v43 }
 0x168   :  { %v869_v15 = vsel %vm364_vm4, %v843_v49, %v2182_v53  ;;  %v873_v58 = vsel %vm364_vm4, %v2212_v60, %v843_v49  ;;  %v879_v56 = vsel %vm364_vm4, %v863_v8, %v2154_v35  ;;  %v841_v29 = vpop.permute.xlu0 %840 }
 0x169   :  { %v895_v38 = vmul.f32 %v883_v41, %v873_v58  ;;  %v896_v31 = vmul.f32 %v2217_v52, %v869_v15  ;;  %v906_v61 = vmul.f32 %v2201_v47, %v879_v56  ;;  %v872_v27 = vsel %vm364_vm4, %v2136_v23, %v841_v29 }
 0x16a   :  { %v891_v36 = vmul.f32 %v883_v41, %v872_v27  ;;  %v2366_v27 = vld [vmem:[#allocation23_spill] sm:$0xff] }
 0x16b   :  { %v911_v4 = vadd.f32 %v895_v38, %v820_v9  ;;  %v912_v0 = vadd.f32 %v896_v31, %v821_v16  ;;  %v922_v57 = vadd.f32 %v906_v61, %v831_v20  ;;  %v825_v38 = vadd.f32 %v809_v17, %v2142_v44  ;;  %v2363_v31 = vld [vmem:[#allocation27_spill] sm:$0xff]  ;;  %v2365_v20 = vld [vmem:[#allocation21_spill] sm:$0xff] }
 0x16c   :  { %v907_v19 = vadd.f32 %v891_v36, %v816_v45  ;;  %v810_v56 = vmul.f32 %v794_v37, %v2363_v31  ;;  %v806_v61 = vmul.f32 %v794_v37, %v2365_v20 }
 0x16d   :  { %927 = vst [vmem:[#allocation8 + $0x20] sm:$0xff] %v911_v4  ;;  %v807_v4 = vmul.f32 %v2192_v28, %v2366_v27 }
 0x16e   :  { %928 = vst [vmem:[#allocation8 + $0x28] sm:$0xff] %v912_v0  ;;  %v826_v0 = vadd.f32 %v810_v56, %v2145_v13 }
 0x16f   :  { %938 = vst [vmem:[#allocation8 + $0x78] sm:$0xff] %v922_v57  ;;  %v849_v59 = vpop.permute.xlu1 %848  ;;  %v823_v3 = vadd.f32 %v807_v4, %v2161_v6 }
 0x170   :  { %923 = vst [vmem:[#allocation8] sm:$0xff] %v907_v19  ;;  %v864_v23 = vsel %vm364_vm4, %v849_v59, %v857_v39  ;;  %v868_v48 = vsel %vm364_vm4, %v841_v29, %v849_v59  ;;  %v847_v62 = vpop.permute.xlu0 %846  ;;  %v2364_v29 = vld [vmem:[#allocation28_spill] sm:$0xff] }
 0x171   :  { %v892_v46 = vmul.f32 %v2217_v52, %v868_v48  ;;  %v893_v30 = vmul.f32 %v885_v51, %v864_v23  ;;  %v875_v26 = vsel %vm364_vm4, %v2154_v35, %v847_v62  ;;  %v811_v22 = vmul.f32 %v2192_v28, %v2364_v29 }
 0x172   :  { %v903_v39 = vmul.f32 %v883_v41, %v875_v26  ;;  %v830_v41 = vadd.f32 %v814_v34, %v2176_v32  ;;  %v822_v28 = vadd.f32 %v806_v61, %v2159_v40 }
 0x173   :  { %v908_v14 = vadd.f32 %v892_v46, %v817_v11  ;;  %v909_v18 = vadd.f32 %v893_v30, %v818_v12  ;;  %v827_v45 = vadd.f32 %v811_v22, %v2197_v1 }
 0x174   :  { %v919_v50 = vadd.f32 %v903_v39, %v828_v25 }
 0x175   :  { %924 = vst [vmem:[#allocation8 + $0x8] sm:$0xff] %v908_v14 }
 0x176   :  { %925 = vst [vmem:[#allocation8 + $0x10] sm:$0xff] %v909_v18 }
 0x177   :  { %935 = vst [vmem:[#allocation8 + $0x60] sm:$0xff] %v919_v50  ;;  %v855_v54 = vpop.permute.xlu1 %854 }
 0x178   :  { %v867_v49 = vsel %vm364_vm4, %v855_v54, %v863_v8  ;;  %v871_v35 = vsel %vm364_vm4, %v847_v62, %v855_v54  ;;  %v853_v15 = vpop.permute.xlu0 %852 }
 0x179   :  { %v904_v7 = vmul.f32 %v2217_v52, %v871_v35  ;;  %v905_v9 = vmul.f32 %v885_v51, %v867_v49  ;;  %v870_v42 = vsel %vm364_vm4, %v2169_v24, %v853_v15 }
 0x17a   :  { %v900_v8 = vmul.f32 %v2217_v52, %v870_v42 }
 0x17b   :  { %v920_v58 = vadd.f32 %v904_v7, %v829_v21  ;;  %v921_v16 = vadd.f32 %v905_v9, %v830_v41 }
 0x17c   :  { %v916_v32 = vadd.f32 %v900_v8, %v825_v38 }
 0x17d   :  { %936 = vst [vmem:[#allocation8 + $0x68] sm:$0xff] %v920_v58 }
 0x17e   :  { %937 = vst [vmem:[#allocation8 + $0x70] sm:$0xff] %v921_v16 }
 0x17f   :  { %932 = vst [vmem:[#allocation8 + $0x48] sm:$0xff] %v916_v32  ;;  %v861_v24 = vpop.permute.xlu1 %860 }
 0x180   :  { %v866_v44 = vsel %vm364_vm4, %v853_v15, %v861_v24  ;;  %v878_v52 = vsel %vm364_vm4, %v861_v24, %v2203_v63  ;;  %v859_v57 = vpop.permute.xlu0 %858 }
 0x181   :  { %v901_v36 = vmul.f32 %v885_v51, %v866_v44  ;;  %v902_v37 = vmul.f32 %v2201_v47, %v878_v52  ;;  %v865_v10 = vsel %vm364_vm4, %v2182_v53, %v859_v57  ;;  %v877_v63 = vsel %vm364_vm4, %v859_v57, %v2212_v60 }
 0x182   :  { %v897_v55 = vmul.f32 %v885_v51, %v865_v10  ;;  %v898_v1 = vmul.f32 %v2201_v47, %v877_v63 }
 0x183   :  { %v917_v19 = vadd.f32 %v901_v36, %v826_v0  ;;  %v918_v13 = vadd.f32 %v902_v37, %v827_v45 }
 0x184   :  { %v913_v40 = vadd.f32 %v897_v55, %v822_v28  ;;  %v914_v6 = vadd.f32 %v898_v1, %v823_v3 }
 0x185   :  { %933 = vst [vmem:[#allocation8 + $0x50] sm:$0xff] %v917_v19 }
 0x186   :  { %934 = vst [vmem:[#allocation8 + $0x58] sm:$0xff] %v918_v13 }
 0x187   :  { %929 = vst [vmem:[#allocation8 + $0x30] sm:$0xff] %v913_v40 }
 0x188   :  { %930 = vst [vmem:[#allocation8 + $0x38] sm:$0xff] %v914_v6 }
 0x189   :  { %951 = dma.vmem_to_hbm [thread:$0]  %s944_s30, 2048, %s946_s6, [#allocation4], %s1079_s24, %s1079_s24, %s1080_s25  }
 0x18a   :  { %1073 = dma.done.wait [#allocation4], 2048  }
 0x18b   :  { %1074 = vsyncadd [#allocation4], 4294965248 }
 0x18c   :  { %956 = vsyncpa [#allocation3], 1 }
 0x18d   :  { %957 = vsyncpa [#allocation6], 1 }
 0x18e   :  { %958 = vsyncpa [#allocation4], 1 }

</bundles_post_ra>
